<compile_context>
chip_gen: v7x
topology: tpu7x:2x2x1
jax: 0.10.0
libtpu: 0.0.40
codegen_flags: <defaults>
</compile_context>

<pallas_src>
import functools

import jax
import jax.numpy as jnp
from jax.experimental import pallas as pl
from jax.experimental.pallas import tpu as pltpu


# ----------------------------------------------------------------------------
# Helpers
# ----------------------------------------------------------------------------
def _round_up(v, m):
    return ((v + m - 1) // m) * m


def _padded_bytes(shape, dtype):
    """VMEM bytes of a block once laid out with (sublane, 128)-lane tiling."""
    itemsize = jnp.dtype(dtype).itemsize
    shape = tuple(int(d) for d in shape)
    if len(shape) == 0:
        return max(4, itemsize)
    if len(shape) == 1:
        shape = (1,) + shape
    sub = max(8, 32 // max(itemsize, 1))
    lead = 1
    for d in shape[:-2]:
        lead *= d
    return lead * _round_up(shape[-2], sub) * _round_up(shape[-1], 128) * itemsize


def _vmem_capacity_bytes():
    """Best-effort physical VMEM query; conservative (v7x-sized) fallback."""
    try:
        return int(pltpu.get_tpu_info().vmem_capacity_bytes)
    except Exception:
        pass
    try:
        kind = jax.devices()[0].device_kind.lower()
        if any(t in kind for t in ("v4", "v5", "v6", "trillium")):
            return 128 << 20
    except Exception:
        pass
    return 64 << 20


def _pick_batch_block(B, per_batch_bytes, target_bytes, min_steps):
    """Largest divisor of B whose block stays under target, keeping at least
    min(B, min_steps) grid steps (>= 2 per v7x TensorCore)."""
    need_steps = min(B, min_steps)
    best = 1
    for cand in range(1, B + 1):
        if B % cand:
            continue
        if cand > 1 and cand * per_batch_bytes > target_bytes:
            continue
        if B // cand < need_steps:
            continue
        best = cand
    return best


def _pick_hw_tile(HW, C, dtype, target_bytes):
    """Largest multiple-of-128 HW tile (<= HW) whose block fits target_bytes.
    If HW <= 128, use the full dim (always legal as a block dim)."""
    itemsize = jnp.dtype(dtype).itemsize
    sub = max(8, 32 // max(itemsize, 1))
    c_pad = _round_up(C, sub)
    if HW <= 128:
        return HW
    best = 128
    t = 256
    while t <= HW:
        if c_pad * t * itemsize <= target_bytes:
            best = t
        t += 128
    return best


# ----------------------------------------------------------------------------
# Kernels
# ----------------------------------------------------------------------------
def _squeeze_excite(pooled, w1, b1, w2, b2, use_mxu):
    """pooled: (Bb, C) f32. w1: (Cr, C), b1: (1, Cr), w2: (C, Cr), b2: (1, C)."""
    if use_mxu:
        # Large C: put the FCs on the MXU (contract on the shared C / Cr dim).
        z1 = jax.lax.dot_general(pooled, w1, (((1,), (1,)), ((), ())),
                                 preferred_element_type=jnp.float32)
        z1 = jnp.maximum(z1 + b1, 0.0)
        z2 = jax.lax.dot_general(z1, w2, (((1,), (1,)), ((), ())),
                                 preferred_element_type=jnp.float32)
    else:
        # Small C: broadcast-multiply + lane reduce (VPU/XLU); negligible cost.
        z1 = jnp.sum(pooled[:, None, :] * w1[None, :, :], axis=-1)
        z1 = jnp.maximum(z1 + b1, 0.0)
        z2 = jnp.sum(z1[:, None, :] * w2[None, :, :], axis=-1)
    return jax.nn.sigmoid(z2 + b2)


def _ca_fused_kernel(inv_hw, use_mxu,
                     x_ref, w1_ref, b1_ref, w2_ref, b2_ref, o_ref):
    """Fully fused CA layer for a (Bb, C, HW) block (HW = full spatial dim)."""
    x = x_ref[...].astype(jnp.float32)                       # f32 accumulation
    pooled = jnp.sum(x, axis=-1) * inv_hw                    # (Bb, C)
    s = _squeeze_excite(pooled,
                        w1_ref[...].astype(jnp.float32),
                        b1_ref[...].astype(jnp.float32),
                        w2_ref[...].astype(jnp.float32),
                        b2_ref[...].astype(jnp.float32),
                        use_mxu)                              # (Bb, C)
    o_ref[...] = (x * s[:, :, None]).astype(o_ref.dtype)


def _ca_pool_kernel(inv_hw, hw_total, hw_tile, use_mxu,
                    x_ref, w1_ref, b1_ref, w2_ref, b2_ref, s_ref, acc_ref):
    """Split-path phase 1: accumulate the spatial sum over HW tiles (masking
    the ragged tail), then run the squeeze/excite FCs + sigmoid on the final
    tile.  Grid = (B, n_hw_tiles); HW axis is 'arbitrary' (reduction)."""
    h = pl.program_id(1)

    @pl.when(h == 0)
    def _():
        acc_ref[...] = jnp.zeros_like(acc_ref)

    x = x_ref[...].astype(jnp.float32)                       # (1, C, hw_tile)
    if hw_total % hw_tile:                                    # static check
        lane = jax.lax.broadcasted_iota(jnp.int32, x.shape, x.ndim - 1)
        valid = (h * hw_tile + lane) < hw_total
        x = jnp.where(valid, x, 0.0)
    acc_ref[...] += jnp.sum(x, axis=-1)                       # (1, C) f32

    @pl.when(h == pl.num_programs(1) - 1)
    def _():
        pooled = acc_ref[...] * inv_hw
        s_ref[...] = _squeeze_excite(
            pooled,
            w1_ref[...].astype(jnp.float32),
            b1_ref[...].astype(jnp.float32),
            w2_ref[...].astype(jnp.float32),
            b2_ref[...].astype(jnp.float32),
            use_mxu).astype(s_ref.dtype)


def _ca_scale_kernel(x_ref, s_ref, o_ref):
    """Split-path phase 2: tiled lane-dense elementwise rescale."""
    s = s_ref[...].astype(jnp.float32)                        # (1, C)
    o_ref[...] = (x_ref[...].astype(jnp.float32) * s[:, :, None]).astype(o_ref.dtype)


# ----------------------------------------------------------------------------
# Wrapper
# ----------------------------------------------------------------------------
def ca_layer(x, w1, b1, w2, b2, *,
             max_fused_block_bytes=None,
             target_block_bytes=None,
             donate_x=False):
    """x: (B, C, H, W). w1: (Cr, C), b1: (Cr,), w2: (C, Cr), b2: (C,)."""
    B, C, H, W = x.shape
    Cr = w1.shape[0]
    HW = H * W
    itemsize = jnp.dtype(x.dtype).itemsize
    inv_hw = 1.0 / float(HW)
    use_mxu = C >= 256                 # MXU FCs only pay off for large C

    # ---- generation-aware budgets -------------------------------------------
    big_vmem = _vmem_capacity_bytes() >= (100 << 20)          # v5e/v6e: 128 MiB
    if max_fused_block_bytes is None:
        max_fused_block_bytes = (16 << 20) if big_vmem else (4 << 20)
    if target_block_bytes is None:
        target_block_bytes = 4 << 20
    vmem_clamp_hi = (96 << 20) if big_vmem else (40 << 20)
    phase1_target = (8 << 20) if big_vmem else (4 << 20)

    x_flat = x.reshape(B, C, HW)                              # no padding
    b1_row = b1.reshape(1, Cr)
    b2_row = b2.reshape(1, C)

    weight_bytes = sum(_padded_bytes(a.shape, a.dtype)
                       for a in (w1, b1_row, w2, b2_row))
    raw_weight_bytes = sum(int(a.size) * jnp.dtype(a.dtype).itemsize
                           for a in (w1, b1_row, w2, b2_row))

    per_batch_io = _padded_bytes((1, C, HW), x.dtype)
    per_batch_f32 = _padded_bytes((1, C, HW), jnp.float32)
    f32_extra_per_batch = per_batch_f32 if itemsize < 4 else 0
    per_batch_budget = per_batch_io + f32_extra_per_batch

    fused_alias = {0: 0} if donate_x else {}

    if per_batch_budget <= max_fused_block_bytes:
        # ---------------- fused single-kernel path ----------------
        Bb = _pick_batch_block(B, per_batch_budget, target_block_bytes,
                               min_steps=4)
        n_blocks = B // Bb
        block_bytes = Bb * per_batch_io

        # double-buffered in + out blocks, f32 compute temp, weights, headroom
        vmem_needed = (4 * block_bytes + Bb * f32_extra_per_batch
                       + 4 * weight_bytes + (2 << 20))
        vmem_limit = int(min(max(vmem_needed, 16 << 20), vmem_clamp_hi))

        cost = pl.CostEstimate(
            flops=int(2 * B * C * HW + 4 * B * C * Cr),
            transcendentals=int(B * C),
            bytes_accessed=int(2 * B * C * HW * itemsize + raw_weight_bytes),
        )

        out_flat = pl.pallas_call(
            functools.partial(_ca_fused_kernel, inv_hw, use_mxu),
            out_shape=jax.ShapeDtypeStruct((B, C, HW), x.dtype),
            grid_spec=pltpu.PrefetchScalarGridSpec(
                num_scalar_prefetch=0,
                grid=(n_blocks,),
                in_specs=[
                    pl.BlockSpec((Bb, C, HW), lambda b: (b, 0, 0)),
                    pl.BlockSpec((Cr, C), lambda b: (0, 0)),
                    pl.BlockSpec((1, Cr), lambda b: (0, 0)),
                    pl.BlockSpec((C, Cr), lambda b: (0, 0)),
                    pl.BlockSpec((1, C), lambda b: (0, 0)),
                ],
                out_specs=pl.BlockSpec((Bb, C, HW), lambda b: (b, 0, 0)),
            ),
            compiler_params=pltpu.CompilerParams(
                dimension_semantics=("parallel",),
                vmem_limit_bytes=vmem_limit),
            cost_estimate=cost,
            input_output_aliases=fused_alias,
        )(x_flat, w1, b1_row, w2, b2_row)
    else:
        # ---------------- split two-kernel path (very large H*W) ----------------
        # Phase 1: pooled sum -> FC -> sigmoid scale, (B, C) in f32.
        hw_tile = _pick_hw_tile(HW, C, x.dtype, phase1_target)
        n_hw = -(-HW // hw_tile)
        tile_io = _padded_bytes((1, C, hw_tile), x.dtype)
        tile_f32 = _padded_bytes((1, C, hw_tile), jnp.float32)

        vmem_needed_a = 2 * tile_io + 2 * tile_f32 + 4 * weight_bytes + (2 << 20)
        vmem_limit_a = int(min(max(vmem_needed_a, 16 << 20), vmem_clamp_hi))

        s = pl.pallas_call(
            functools.partial(_ca_pool_kernel, inv_hw, HW, hw_tile, use_mxu),
            out_shape=jax.ShapeDtypeStruct((B, C), jnp.float32),
            grid_spec=pltpu.PrefetchScalarGridSpec(
                num_scalar_prefetch=0,
                grid=(B, n_hw),
                in_specs=[
                    pl.BlockSpec((1, C, hw_tile), lambda b, h: (b, 0, h)),
                    pl.BlockSpec((Cr, C), lambda b, h: (0, 0)),
                    pl.BlockSpec((1, Cr), lambda b, h: (0, 0)),
                    pl.BlockSpec((C, Cr), lambda b, h: (0, 0)),
                    pl.BlockSpec((1, C), lambda b, h: (0, 0)),
                ],
                out_specs=pl.BlockSpec((1, C), lambda b, h: (b, 0)),
                scratch_shapes=[pltpu.VMEM((1, C), jnp.float32)],
            ),
            compiler_params=pltpu.CompilerParams(
                dimension_semantics=("parallel", "arbitrary"),
                vmem_limit_bytes=vmem_limit_a),
            cost_estimate=pl.CostEstimate(
                flops=int(B * C * HW + 4 * B * C * Cr),
                transcendentals=int(B * C),
                bytes_accessed=int(B * C * HW * itemsize + raw_weight_bytes
                                   + B * C * 4)),
        )(x_flat, w1, b1_row, w2, b2_row)

        # Phase 2: tiled lane-dense elementwise rescale.
        hw_tile2 = _pick_hw_tile(HW, C, x.dtype, target_block_bytes)
        n_hw2 = -(-HW // hw_tile2)
        tile2_io = _padded_bytes((1, C, hw_tile2), x.dtype)
        tile2_f32 = _padded_bytes((1, C, hw_tile2), jnp.float32)
        f32_extra2 = tile2_f32 if itemsize < 4 else 0

        vmem_needed_b = (4 * tile2_io + f32_extra2
                         + 4 * _padded_bytes((1, C), jnp.float32) + (2 << 20))
        vmem_limit_b = int(min(max(vmem_needed_b, 16 << 20), vmem_clamp_hi))

        out_flat = pl.pallas_call(
            _ca_scale_kernel,
            out_shape=jax.ShapeDtypeStruct((B, C, HW), x.dtype),
            grid_spec=pltpu.PrefetchScalarGridSpec(
                num_scalar_prefetch=0,
                grid=(B, n_hw2),
                in_specs=[
                    pl.BlockSpec((1, C, hw_tile2), lambda b, h: (b, 0, h)),
                    pl.BlockSpec((1, C), lambda b, h: (b, 0)),
                ],
                out_specs=pl.BlockSpec((1, C, hw_tile2), lambda b, h: (b, 0, h)),
            ),
            compiler_params=pltpu.CompilerParams(
                dimension_semantics=("parallel", "parallel"),
                vmem_limit_bytes=vmem_limit_b),
            cost_estimate=pl.CostEstimate(
                flops=int(B * C * HW),
                transcendentals=0,
                bytes_accessed=int(2 * B * C * HW * itemsize + B * C * 4)),
            input_output_aliases=fused_alias,
        )(x_flat, s)

    return out_flat.reshape(B, C, H, W)


# ----------------------------------------------------------------------------
# Pure-JAX reference (matches the PyTorch forward)
# ----------------------------------------------------------------------------
def ca_layer_ref(x, w1, b1, w2, b2):
    y = jnp.mean(x, axis=(2, 3), keepdims=True)               # (B, C, 1, 1)
    y = jnp.einsum('oc,bcxy->boxy', w1, y) + b1[None, :, None, None]
    y = jnp.maximum(y, 0.0)
    y = jnp.einsum('oc,bcxy->boxy', w2, y) + b2[None, :, None, None]
    y = jax.nn.sigmoid(y)
    return x * y


if __name__ == "__main__":
    B, C, reduction = 2, 32, 16
    Cr = C // reduction

    key = jax.random.PRNGKey(0)
    kx, k1, k2, k3, k4, kx2, kx3 = jax.random.split(key, 7)

    w1 = jax.random.normal(k1, (Cr, C), dtype=jnp.float32) * 0.1
    b1 = jax.random.normal(k2, (Cr,), dtype=jnp.float32) * 0.1
    w2 = jax.random.normal(k3, (C, Cr), dtype=jnp.float32) * 0.1
    b2 = jax.random.normal(k4, (C,), dtype=jnp.float32) * 0.1

    # Case 1: fused path, 128-aligned spatial extent.
    x = jax.random.normal(kx, (B, C, 16, 16), dtype=jnp.float32)
    out = jax.block_until_ready(ca_layer(x, w1, b1, w2, b2))
    ref = ca_layer_ref(x, w1, b1, w2, b2)
    assert out.shape == x.shape
    assert jnp.allclose(out, ref, atol=1e-5, rtol=1e-5)

    # Case 2: fused path, non-128-aligned spatial extent (no host pad/slice).
    x2 = jax.random.normal(kx2, (B, C, 10, 10), dtype=jnp.float32)
    out2 = jax.block_until_ready(ca_layer(x2, w1, b1, w2, b2))
    ref2 = ca_layer_ref(x2, w1, b1, w2, b2)
    assert jnp.allclose(out2, ref2, atol=1e-5, rtol=1e-5)

    # Case 3: force the split (pool + scale) path, aligned HW.
    out3 = jax.block_until_ready(
        ca_layer(x, w1, b1, w2, b2, max_fused_block_bytes=0))
    assert jnp.allclose(out3, ref, atol=1e-5, rtol=1e-5)

    # Case 4: force the split path with a ragged spatial tail (exercises the
    # in-kernel lane masking of the partial trailing HW tile).
    x3 = jax.random.normal(kx3, (B, C, 13, 13), dtype=jnp.float32)
    out4 = jax.block_until_ready(
        ca_layer(x3, w1, b1, w2, b2, max_fused_block_bytes=0))
    ref4 = ca_layer_ref(x3, w1, b1, w2, b2)
    assert jnp.allclose(out4, ref4, atol=1e-5, rtol=1e-5)

    # Case 5: bf16 streaming (x/out in bf16, f32 accumulation inside kernel).
    xb = x.astype(jnp.bfloat16)
    outb = jax.block_until_ready(ca_layer(xb, w1, b1, w2, b2))
    refb = ca_layer_ref(xb.astype(jnp.float32), w1, b1, w2, b2)
    assert outb.dtype == jnp.bfloat16
    assert jnp.allclose(outb.astype(jnp.float32), refb, atol=3e-2, rtol=3e-2)

    print("KERNEL_OK")
</pallas_src>

<mosaic_0001>
module attributes {stable_mosaic.version = 11 : i64} {
  func.func @_ca_fused_kernel(%arg0: i32, %arg1: memref<1x32x256xf32, #tpu.memory_space<vmem>>, %arg2: memref<2x32xf32, #tpu.memory_space<vmem>>, %arg3: memref<1x2xf32, #tpu.memory_space<vmem>>, %arg4: memref<32x2xf32, #tpu.memory_space<vmem>>, %arg5: memref<1x32xf32, #tpu.memory_space<vmem>>, %arg6: memref<1x32x256xf32, #tpu.memory_space<vmem>>) attributes {dimension_semantics = [#tpu.dimension_semantics<parallel>], iteration_bounds = array<i64: 2>, scalar_prefetch = 0 : i64, scratch_operands = 0 : i64, tpu.core_type = #tpu.core_type<tc>, window_params = [{transform_indices = @transform_0, window_bounds = array<i64: 1, 32, 256>}, {pipeline_mode = #tpu.pipeline_mode<synchronous>, transform_indices = @transform_1, window_bounds = array<i64: 2, 32>}, {pipeline_mode = #tpu.pipeline_mode<synchronous>, transform_indices = @transform_2, window_bounds = array<i64: 1, 2>}, {pipeline_mode = #tpu.pipeline_mode<synchronous>, transform_indices = @transform_3, window_bounds = array<i64: 32, 2>}, {pipeline_mode = #tpu.pipeline_mode<synchronous>, transform_indices = @transform_4, window_bounds = array<i64: 1, 32>}, {transform_indices = @transform_5, window_bounds = array<i64: 1, 32, 256>}]} {
    %c0 = arith.constant 0 : index
    %c0_0 = arith.constant 0 : index
    %c0_1 = arith.constant 0 : index
    %0 = vector.load %arg1[%c0, %c0_0, %c0_1] : memref<1x32x256xf32, #tpu.memory_space<vmem>>, vector<1x32x256xf32>
    %cst = arith.constant dense<0.000000e+00> : vector<1x32xf32>
    %1 = vector.multi_reduction <add>, %0, %cst [2] : vector<1x32x256xf32> to vector<1x32xf32>
    %cst_2 = arith.constant 3.906250e-03 : f32
    %2 = vector.broadcast %cst_2 : f32 to vector<1x32xf32>
    %3 = arith.mulf %1, %2 : vector<1x32xf32>
    %c0_3 = arith.constant 0 : index
    %c0_4 = arith.constant 0 : index
    %4 = vector.load %arg2[%c0_3, %c0_4] : memref<2x32xf32, #tpu.memory_space<vmem>>, vector<2x32xf32>
    %c0_5 = arith.constant 0 : index
    %c0_6 = arith.constant 0 : index
    %5 = vector.load %arg3[%c0_5, %c0_6] : memref<1x2xf32, #tpu.memory_space<vmem>>, vector<1x2xf32>
    %c0_7 = arith.constant 0 : index
    %c0_8 = arith.constant 0 : index
    %6 = vector.load %arg4[%c0_7, %c0_8] : memref<32x2xf32, #tpu.memory_space<vmem>>, vector<32x2xf32>
    %c0_9 = arith.constant 0 : index
    %c0_10 = arith.constant 0 : index
    %7 = vector.load %arg5[%c0_9, %c0_10] : memref<1x32xf32, #tpu.memory_space<vmem>>, vector<1x32xf32>
    %8 = vector.shape_cast %3 : vector<1x32xf32> to vector<1x1x32xf32>
    %9 = vector.shape_cast %4 : vector<2x32xf32> to vector<1x2x32xf32>
    %10 = vector.broadcast %8 : vector<1x1x32xf32> to vector<1x2x32xf32>
    %11 = arith.mulf %10, %9 : vector<1x2x32xf32>
    %cst_11 = arith.constant dense<0.000000e+00> : vector<1x2xf32>
    %12 = vector.multi_reduction <add>, %11, %cst_11 [2] : vector<1x2x32xf32> to vector<1x2xf32>
    %13 = arith.addf %12, %5 : vector<1x2xf32>
    %cst_12 = arith.constant 0.000000e+00 : f32
    %14 = vector.broadcast %cst_12 : f32 to vector<1x2xf32>
    %15 = arith.maximumf %13, %14 : vector<1x2xf32>
    %16 = vector.shape_cast %15 : vector<1x2xf32> to vector<1x1x2xf32>
    %17 = vector.shape_cast %6 : vector<32x2xf32> to vector<1x32x2xf32>
    %18 = vector.broadcast %16 : vector<1x1x2xf32> to vector<1x32x2xf32>
    %19 = arith.mulf %18, %17 : vector<1x32x2xf32>
    %cst_13 = arith.constant dense<0.000000e+00> : vector<1x32xf32>
    %20 = vector.multi_reduction <add>, %19, %cst_13 [2] : vector<1x32x2xf32> to vector<1x32xf32>
    %21 = arith.addf %20, %7 : vector<1x32xf32>
    %22 = arith.negf %21 : vector<1x32xf32>
    %23 = math.exp %22 : vector<1x32xf32>
    %cst_14 = arith.constant 1.000000e+00 : f32
    %24 = vector.broadcast %cst_14 : f32 to vector<1x32xf32>
    %25 = arith.addf %24, %23 : vector<1x32xf32>
    %26 = arith.divf %24, %25 : vector<1x32xf32>
    %27 = vector.shape_cast %26 : vector<1x32xf32> to vector<1x32x1xf32>
    %28 = vector.broadcast %27 : vector<1x32x1xf32> to vector<1x32x256xf32>
    %29 = arith.mulf %0, %28 : vector<1x32x256xf32>
    %c0_15 = arith.constant 0 : index
    %c0_16 = arith.constant 0 : index
    %c0_17 = arith.constant 0 : index
    %30 = vector.load %arg6[%c0_15, %c0_16, %c0_17] : memref<1x32x256xf32, #tpu.memory_space<vmem>>, vector<1x32x256xf32>
    tpu.vector_store %arg6[%c0_15, %c0_16, %c0_17], %29 {strides = array<i32>} : memref<1x32x256xf32, #tpu.memory_space<vmem>>, vector<1x32x256xf32>,
    return
  }
  func.func @transform_0(%arg0: i32) -> (i32, i32, i32) {
    %c0_i32 = arith.constant 0 : i32
    %c0_i32_0 = arith.constant 0 : i32
    %c0_i32_1 = arith.constant 0 : i32
    return %arg0, %c0_i32, %c0_i32_0 : i32, i32, i32
  }
  func.func @transform_1(%arg0: i32) -> (i32, i32) {
    %c0_i32 = arith.constant 0 : i32
    %c0_i32_0 = arith.constant 0 : i32
    %c0_i32_1 = arith.constant 0 : i32
    return %c0_i32, %c0_i32_0 : i32, i32
  }
  func.func @transform_2(%arg0: i32) -> (i32, i32) {
    %c0_i32 = arith.constant 0 : i32
    %c0_i32_0 = arith.constant 0 : i32
    %c0_i32_1 = arith.constant 0 : i32
    return %c0_i32, %c0_i32_0 : i32, i32
  }
  func.func @transform_3(%arg0: i32) -> (i32, i32) {
    %c0_i32 = arith.constant 0 : i32
    %c0_i32_0 = arith.constant 0 : i32
    %c0_i32_1 = arith.constant 0 : i32
    return %c0_i32, %c0_i32_0 : i32, i32
  }
  func.func @transform_4(%arg0: i32) -> (i32, i32) {
    %c0_i32 = arith.constant 0 : i32
    %c0_i32_0 = arith.constant 0 : i32
    %c0_i32_1 = arith.constant 0 : i32
    return %c0_i32, %c0_i32_0 : i32, i32
  }
  func.func @transform_5(%arg0: i32) -> (i32, i32, i32) {
    %c0_i32 = arith.constant 0 : i32
    %c0_i32_0 = arith.constant 0 : i32
    %c0_i32_1 = arith.constant 0 : i32
    return %arg0, %c0_i32, %c0_i32_0 : i32, i32, i32
  }
}

</mosaic_0001>

<bundles_post_ra>
// kernel: tpu_custom_call.1
= control target key start
LH: loop header
LB: loop body
LE: loop exit
PB: predicated region body
PF: predicated region fallthrough
CT: control target
= control target key end

     0   :  { %10 = vsyncpa [#allocation3], 0  ;;  %s1819_s0 = inlined_call_operand.hbm [shape: f32[2,32,256], index: 0, kind: input, shape index: {}]   ;;  %s1820_s1 = inlined_call_operand.vmem [shape: f32[2,32], index: 1, kind: input, shape index: {}]   ;;  %s1821_s2 = inlined_call_operand.vmem [shape: f32[1,2], index: 2, kind: input, shape index: {}]   ;;  %s1822_s3 = inlined_call_operand.vmem [shape: f32[32,2], index: 3, kind: input, shape index: {}]   ;;  %s1823_s4 = inlined_call_operand.vmem [shape: f32[1,32], index: 4, kind: input, shape index: {}]   ;;  %s1824_s5 = inlined_call_operand.hbm [shape: f32[2,32,256], index: 5, kind: output, shape index: {}]  }
   0x1   :  { %12 = vsyncpa [#allocation3 + $0x1], 0 }
   0x2   :  { %13 = vsyncpa [#allocation4], 0 }
   0x3   :  { %15 = vsyncpa [#allocation4 + $0x1], 0  ;;  %s1425_s18 = smov 0   ;;  %s1427_s19 = smov 0  }
   0x4   :  { %s1429_s20 = smov 0   ;;  %s1431_s21 = smov 0  }
   0x5 LB: > { %s1446_s22 = sadd.s32 4294967295, %s1386_s21   ;;  %s1199_s23 = sadd.s32 4294967294, %s1386_s21   ;;  %s1386_s21 = sphi %s1431_s21, %s1837_s21   ;;  %s1382_s20 = sphi %s1429_s20, %s1836_s20   ;;  %s1378_s19 = sphi %s1427_s19, %s1835_s19   ;;  %s1374_s18 = sphi %s1425_s18, %s1834_s18  }
   0x6   : > { %s1450_s24 = sadd.s32 1, %s1386_s21   ;;  %s28_s25 = sadd.s32 1, %s1382_s20 }
   0x7   : > { %s25_s26 = ssub.s32 %s1386_s21, %s1450_s24  ;;  %p35_p0 = scmp.ne.s32.totalorder %s1382_s20, %s1378_s19 }
   0x8   : > { %p26_p1 = scmp.eq.s32.totalorder %s25_s26, 0  ;;  %p36_p2 = scmp.eq.s32.totalorder %s1386_s21, 0 }
   0x9   : > { %p41_p3 = scmp.ne.s32.totalorder %s1378_s19, %s1374_s18  ;;  %p42_p4 = scmp.eq.s32.totalorder %s1446_s22, 0 }
   0xa   : > { %s1462_s27 = scalar_select %p26_p1, %s1382_s20, %s28_s25  }
   0xb   : > { %p1464_p5 = por %p36_p2, %p35_p0  ;;  %p1468_p6 = por %p42_p4, %p41_p3 }
   0xc   : > { %p149_p7 = scmp.eq.s32.totalorder %s1446_s22, 1  ;;  %p155_p8 = scmp.eq.s32.totalorder %s1199_s23, 1 }
   0xd   : > { %p1233_p10 = scmp.lt.s32.totalorder %s1386_s21, 2  ;;  %s187_s7 = sand.u32 1, %s1382_s20  }
   0xe   : > { %p1475_p11 = por %p149_p7, %p35_p0  ;;  %p1479_p12 = por %p155_p8, %p41_p3 }
   0xf   : > { %s1219_s8 = sshll.u32 %s1386_s21, 10  ;;  %s1202_s9 = sshll.u32 %s187_s7, 6 }
  0x10   : > { %s1828_s30 = scalar_select %p1475_p11, 1, 0 }
  0x11   : > { %s1829_s6 = scalar_select %p1479_p12, 1, 0 }
  0x12   : > { %s1488_s12 = scalar_lea.hbm %s1819_s0, %s1219_s8  ;;  %s191_s13 = scalar_lea.vmem [#allocation2], %s1202_s9 }
  0x13   : > { %s198_s14 = sshll.u32 %s191_s13, 4  ;;  %p1492_p13 = pnand %p1233_p10, %p1464_p5  ;;  %s1496_s14 = int_to_ptr.vmem [resolvable:$true] %s198_s14 }
  0x14   : > { %s1498_s16 = scalar_lea.sflag [#allocation3], %s187_s7  ;;  %s1290_s17 = scalar_lea.hbm %s1488_s12, 1024 }
  0x15   : > { %p1291_p0 = scmp.ne.s32.totalorder %s1488_s12, %s1290_s17  ;;  %p1292_p1 = pneg %p1492_p13 }
  0x16   : > { %s1295_s26 = scalar_lea.hbm %s1819_s0, 2048  ;;  %p1296_p4 = scmp.lt.u32.totalorder %s1488_s12, %s1819_s0 }
  0x17   : > { %p1293_p2 = pnand %p1292_p1, %p1291_p0  ;;  %p1297_p5 = scmp.lt.u32.totalorder %s1295_s26, %s1290_s17 }
  0x18   : > { %p1299_p8 = scmp.lt.u32.totalorder %s1290_s17, %s1488_s12 }
  0x19   : > { %p1294_p3 = pneg %p1293_p2  ;;  %p1298_p7 = por %p1297_p5, %p1296_p4 }
  0x1b   : > { %p1300_p10 = por %p1299_p8, %p1298_p7 }
  0x1d   : > { %p1301_p9 = pnand %p1300_p10, %p1294_p3 }
  0x1f   : > { %1304 = shalt.err (!%p1301_p9)
}
  0x20   : > { %s1305_s7 = scalar_lea.vmem %s1496_s14, 1024  ;;  %s1388_s9 = smov [#allocation2]  }
  0x21   : > { %p1306_p0 = scmp.ne.s32.totalorder %s1496_s14, %s1305_s7  ;;  %s1310_s10 = sshll.u32 %s1388_s9, 4  ;;  %s1311_s10 = int_to_ptr.vmem [resolvable:$false] %s1310_s10 }
  0x22   : > { %s1312_s11 = scalar_lea.vmem %s1311_s10, 2048  ;;  %p1313_p11 = scmp.lt.s32.totalorder %s1496_s14, %s1311_s10 }
  0x23   : > { %p1308_p2 = pnand %p1306_p0, %p1292_p1  ;;  %p1314_p4 = scmp.lt.s32.totalorder %s1312_s11, %s1305_s7 }
  0x25   : > { %p1309_p12 = pneg %p1308_p2  ;;  %p1315_p5 = por %p1314_p4, %p1313_p11 }
  0x27   : > { %p1316_p7 = pnand %p1315_p5, %p1309_p12 }
  0x29   : > { %1319 = shalt.err (!%p1316_p7)
}
  0x2a   : > { %s1389_s13 = smov 256   ;;  %s1390_s17 = smov 16  }
  0x2b   : > { %1228 = dma.hbm_to_vmem [thread:$0]  (!%p1492_p13), %s1488_s12, 1024, %s1496_s14, %s1498_s16, %s1389_s13, %s1389_s13, %s1390_s17  }
  0x2c   : > { %p1205_p9 = scmp.ge.s32.totalorder %s1386_s21, 1  ;;  %p206_p1 = scmp.lt.s32.totalorder %s1386_s21, 3 }
  0x2e   : > { %p207_p3 = pnand %p1205_p9, %p206_p1 }
  0x2f   : > { %s1529_s23 = sand.u32 (!%p207_p3), 1, %s1378_s19  }
  0x30   : > { %210 = sbr.rel (%p207_p3) target bundleno = 1020 (0x3fc), region = 40  ;;  %s1206_s25 = sshll.u32 (!%p207_p3), %s1529_s23, 6 }
  0x31   : > { %s213_s26 = scalar_lea.sflag (!%p207_p3), [#allocation3], %s1529_s23  ;;  %s216_s28 = scalar_lea.vmem (!%p207_p3), [#allocation2], %s1206_s25 }
  0x37   : > { %1365 = dma.done.wait (%p1468_p6), %s213_s26, 1024  }
  0x38   : > { %1367 = vsyncadd (%p1468_p6), %s213_s26, 4294966272  ;;  %v1539_v0 = vld [vmem:[%s216_s28 + $0x20] sm:$0xff]  ;;  %v1541_v1 = vld [vmem:[%s216_s28 + $0x28] sm:$0xff]  ;;  %v275_v12 = vlaneseq  ;;  %v1391_v19 = vmov 0   ;;  %vm372_vm0 = vcmask 130112   ;;  %vm379_vm1 = vcmask 195712  }
  0x39   : > { %v1543_v2 = vld [vmem:[%s216_s28] sm:$0xff]  ;;  %v257_v3 = vadd.f32 %v1541_v1, %v1539_v0  ;;  %v1547_v4 = vld [vmem:[%s216_s28 + $0x8] sm:$0xff]  ;;  %v1549_v5 = vld [vmem:[%s216_s28 + $0x30] sm:$0xff]  ;;  %1273 = vset.pattern.permute.xlu1 %v1391_v19  ;;  %1272 = vset.pattern.permute.xlu0 %v1391_v19  ;;  %vm386_vm2 = vcmask 261312   ;;  %vm407_vm3 = vcmask 1041409   ;;  %vm410_vm4 = vcmask 254976  }
  0x3a   : > { %v1551_v6 = vld [vmem:[%s216_s28 + $0x38] sm:$0xff]  ;;  %v251_v7 = vadd.f32 %v1547_v4, %v1543_v2  ;;  %v1555_v8 = vld [vmem:[%s216_s28 + $0x10] sm:$0xff]  ;;  %v1564_v13 = vshrl.u32 %v275_v12, 7  ;;  %v267_v15 = vld [vmem:[%s1820_s1] sm:$0x3]  ;;  %vm974_vm5 = vcmask 1042434  }
  0x3b   : > { %v1557_v9 = vld [vmem:[%s216_s28 + $0x18] sm:$0xff]  ;;  %258 = vadd.xlane.f32.xlu1 %v257_v3  ;;  %v260_v10 = vadd.f32 %v1551_v6, %v1549_v5  ;;  %v269_v41 = vld [vmem:[%s1822_s3] sm:$0xff]  ;;  %v271_v47 = vld [vmem:[%s1822_s3 + $0x10] sm:$0xff]  ;;  %vm976_vm6 = vcmask 1043459   ;;  %vm978_vm7 = vcmask 1044484   ;;  %vm980_vm8 = vcmask 1045509  }
  0x3c   : > { %252 = vadd.xlane.f32.xlu0 %v251_v7  ;;  %v254_v11 = vadd.f32 %v1557_v9, %v1555_v8  ;;  %v1567_v14 = vsub.s32 0, %v1564_v13  ;;  %v1574_v17 = vsub.s32 1, %v1564_v13  ;;  %v445_v39 = vsub.s32 2, %v1564_v13  ;;  %v1208_v51 = vld [vmem:[%s1821_s2] ss:$0 sm:$0xff]  ;;  %v270_v57 = vld [vmem:[%s1822_s3 + $0x8] sm:$0xff] }
  0x3d   : > { %v452_v45 = vsub.s32 3, %v1564_v13  ;;  %v459_v50 = vsub.s32 4, %v1564_v13  ;;  %v466_v55 = vsub.s32 5, %v1564_v13  ;;  %v473_v61 = vsub.s32 6, %v1564_v13  ;;  %s242_s29 = scalar_lea.vmem [#allocation5], %s1206_s25  ;;  %s1220_s14 = sshll.u32 %s1446_s22, 10 }
  0x3e   : > { %v278_v16 = vrot.slane %v267_v15, %v1567_v14  ;;  %v297_v18 = vrot.slane %v267_v15, %v1574_v17  ;;  %v446_v44 = vrot.slane %v269_v41, %v445_v39  ;;  %v432_v53 = vrot.slane %v269_v41, %v1567_v14  ;;  %v272_v15 = vld [vmem:[%s1822_s3 + $0x18] sm:$0xff]  ;;  %s1126_s12 = sshll.u32 %s242_s29, 4  ;;  %s1773_s16 = scalar_lea.hbm %s1824_s5, %s1220_s14  ;;  %s1766_s12 = int_to_ptr.vmem [resolvable:$true] %s1126_s12 }
  0x3f   : > { %261 = vadd.xlane.f32.xlu1 %v260_v10  ;;  %v565_v49 = vrot.slane %v271_v47, %v452_v45  ;;  %v460_v52 = vrot.slane %v269_v41, %v459_v50  ;;  %v572_v54 = vrot.slane %v271_v47, %v459_v50  ;;  %v439_v56 = vrot.slane %v269_v41, %v1574_v17  ;;  %s1113_s22 = scalar_lea.sflag [#allocation4], %s1529_s23  ;;  %s1320_s8 = scalar_lea.vmem %s1766_s12, 1024 }
  0x40   : > { %255 = vadd.xlane.f32.xlu0 %v254_v11  ;;  %v467_v58 = vrot.slane %v269_v41, %v466_v55  ;;  %v488_v59 = vrot.slane %v270_v57, %v1567_v14  ;;  %v579_v60 = vrot.slane %v271_v47, %v466_v55  ;;  %v495_v62 = vrot.slane %v270_v57, %v1574_v17  ;;  %p1321_p6 = scmp.ne.s32.totalorder %s1766_s12, %s1320_s8  ;;  %p1831_p11 = scmp.ne.s32.totalorder %s1828_s30, 0 }
  0x41   : > { %v474_v63 = vrot.slane %v269_v41, %v473_v61  ;;  %v544_v3 = vrot.slane %v271_v47, %v1567_v14  ;;  %v586_v7 = vrot.slane %v271_v47, %v473_v61  ;;  %v480_v10 = vsub.s32 7, %v1564_v13  ;;  %s1392_s7 = smov [#allocation5]  }
  0x42   : > { %v551_v11 = vrot.slane %v271_v47, %v1574_v17  ;;  %vm982_vm9 = vcmask 1046534   ;;  %vm984_vm10 = vcmask 1047559   ;;  %vm1011_vm11 = vcmask 15360   ;;  %p1322_p12 = pnand %p1321_p6, %p1831_p11  ;;  %s1324_s9 = sshll.u32 %s1392_s7, 4  ;;  %s1325_s9 = int_to_ptr.vmem [resolvable:$false] %s1324_s9 }
  0x43   : > { %v593_v19 = vrot.slane %v271_v47, %v480_v10  ;;  %s1326_s10 = scalar_lea.vmem %s1325_s9, 2048  ;;  %p1327_p8 = scmp.lt.s32.totalorder %s1766_s12, %s1325_s9 }
  0x44   : > { %p1323_p13 = pneg %p1322_p12  ;;  %p1328_p10 = scmp.lt.s32.totalorder %s1326_s10, %s1320_s8 }
  0x46   : > { %p1329_p0 = por %p1328_p10, %p1327_p8 }
  0x48   : > { %p1330_p2 = pnand %p1329_p0, %p1323_p13 }
  0x50   : > { %284 = vbcast.lane.b32.xlu1 %v278_v16, 264 }
  0x54   : > { %299 = vbcast.lane.b32.xlu1 %v297_v18, 256 }
  0x56   : > { %280 = vbcast.lane.b32.xlu0 %v278_v16, 256 }
  0x58   : > { %303 = vbcast.lane.b32.xlu1 %v297_v18, 264 }
  0x5a   : > { %288 = vbcast.lane.b32.xlu0 %v278_v16, 272 }
  0x5c   : > { %307 = vbcast.lane.b32.xlu1 %v297_v18, 272 }
  0x5e   : > { %292 = vbcast.lane.b32.xlu0 %v278_v16, 280  ;;  %v481_v16 = vrot.slane %v269_v41, %v480_v10 }
  0x60   : > { %311 = vbcast.lane.b32.xlu1 %v297_v18, 280  ;;  %v600_v18 = vrot.slane %v272_v15, %v1567_v14  ;;  %v516_v14 = vrot.slane %v270_v57, %v459_v50 }
  0xc8   : > { %v259_v20 = vpop.xlane.xlu1 %258 }
  0xc9   : > { %v253_v21 = vpop.xlane.xlu0 %252  ;;  %v265_v33 = vmul.f32 0.00390625, %v259_v20  ;;  %v607_v20 = vrot.slane %v272_v15, %v1574_v17  ;;  %v635_v17 = vrot.slane %v272_v15, %v466_v55 }
  0xca   : > { %v263_v25 = vmul.f32 0.00390625, %v253_v21  ;;  %v502_v21 = vrot.slane %v270_v57, %v445_v39 }
  0xcc   : > { %v262_v22 = vpop.xlane.xlu1 %261 }
  0xcd   : > { %v256_v23 = vpop.xlane.xlu0 %255  ;;  %v266_v38 = vmul.f32 0.00390625, %v262_v22  ;;  %v558_v22 = vrot.slane %v271_v47, %v445_v39 }
  0xce   : > { %v264_v24 = vmul.f32 0.00390625, %v256_v23  ;;  %v614_v23 = vrot.slane %v272_v15, %v445_v39 }
  0xd0   : > { %v285_v26 = vpop.permute.xlu1 %284 }
  0xd1   : > { %v322_v27 = vmul.f32 %v285_v26, %v264_v24  ;;  %v281_v28 = vpop.permute.xlu0 %280  ;;  %v621_v26 = vrot.slane %v272_v15, %v452_v45 }
  0xd2   : > { %v321_v29 = vmul.f32 %v281_v28, %v263_v25  ;;  %v523_v28 = vrot.slane %v270_v57, %v466_v55 }
  0xd3   : > { %341 = vperm.xlu1 %1273, %v322_v27   ;;  %v628_v27 = vrot.slane %v272_v15, %v459_v50 }
  0xd4   : > { %338 = vperm.xlu0 %1272, %v321_v29   ;;  %v300_v30 = vpop.permute.xlu1 %299  ;;  %v530_v29 = vrot.slane %v270_v57, %v473_v61 }
  0xd5   : > { %v325_v31 = vmul.f32 %v300_v30, %v263_v25  ;;  %v289_v32 = vpop.permute.xlu0 %288  ;;  %v509_v25 = vrot.slane %v270_v57, %v452_v45  ;;  %v642_v30 = vrot.slane %v272_v15, %v473_v61 }
  0xd6   : > { %v323_v35 = vmul.f32 %v289_v32, %v265_v33  ;;  %v649_v32 = vrot.slane %v272_v15, %v480_v10 }
  0xd7   : > { %350 = vperm.xlu1 %1273, %v325_v31   ;;  %v537_v31 = vrot.slane %v270_v57, %v480_v10 }
  0xd8   : > { %v304_v34 = vpop.permute.xlu1 %303 }
  0xd9   : > { %v326_v36 = vmul.f32 %v304_v34, %v264_v24  ;;  %v293_v37 = vpop.permute.xlu0 %292  ;;  %v453_v24 = vrot.slane %v269_v41, %v452_v45  ;;  %v362_v34 = vand.u32 127, %v275_v12 }
  0xda   : > { %v324_v42 = vmul.f32 %v293_v37, %v266_v38 }
  0xdb   : > { %353 = vperm.xlu0 %1272, %v326_v36   ;;  %344 = vperm.xlu1 %1273, %v323_v35   ;;  %v367_v37 = vadd.s32 4294967288, %v362_v34  ;;  %v381_v39 = vadd.s32 4294967272, %v362_v34 }
  0xdc   : > { %v308_v40 = vpop.permute.xlu1 %307 }
  0xdd   : > { %v327_v43 = vmul.f32 %v308_v40, %v265_v33  ;;  %v384_v45 = vsub.s32 %v381_v39, %v1564_v13 }
  0xdf   : > { %356 = vperm.xlu0 %1272, %v327_v43   ;;  %347 = vperm.xlu1 %1273, %v324_v42   ;;  %v1608_v42 = vsub.s32 %v362_v34, %v1564_v13  ;;  %v370_v43 = vsub.s32 %v367_v37, %v1564_v13 }
  0xe0   : > { %v312_v46 = vpop.permute.xlu1 %311 }
  0xe1   : > { %v328_v48 = vmul.f32 %v312_v46, %v266_v38  ;;  %v374_v38 = vadd.s32 4294967280, %v362_v34 }
  0xe3   : > { %359 = vperm.xlu0 %1272, %v328_v48   ;;  %448 = vbcast.lane.b32.xlu1 %v446_v44, 256  ;;  %v377_v44 = vsub.s32 %v374_v38, %v1564_v13 }
  0xe7   : > { %567 = vbcast.lane.b32.xlu1 %v565_v49, 256  ;;  %420 = vbcast.lane.b32.xlu0 %v1208_v51, 256 }
  0xeb   : > { %462 = vbcast.lane.b32.xlu1 %v460_v52, 256  ;;  %434 = vbcast.lane.b32.xlu0 %v432_v53, 256 }
  0xef   : > { %574 = vbcast.lane.b32.xlu1 %v572_v54, 256  ;;  %441 = vbcast.lane.b32.xlu0 %v439_v56, 256 }
  0xf3   : > { %469 = vbcast.lane.b32.xlu1 %v467_v58, 256  ;;  %490 = vbcast.lane.b32.xlu0 %v488_v59, 256 }
  0xf7   : > { %581 = vbcast.lane.b32.xlu1 %v579_v60, 256  ;;  %497 = vbcast.lane.b32.xlu0 %v495_v62, 256 }
  0xfb   : > { %476 = vbcast.lane.b32.xlu1 %v474_v63, 256  ;;  %546 = vbcast.lane.b32.xlu0 %v544_v3, 256 }
  0xff   : > { %588 = vbcast.lane.b32.xlu1 %v586_v7, 256  ;;  %553 = vbcast.lane.b32.xlu0 %v551_v11, 256 }
 0x103   : > { %483 = vbcast.lane.b32.xlu1 %v481_v16, 256  ;;  %602 = vbcast.lane.b32.xlu0 %v600_v18, 256 }
 0x107   : > { %595 = vbcast.lane.b32.xlu1 %v593_v19, 256  ;;  %609 = vbcast.lane.b32.xlu0 %v607_v20, 256 }
 0x10b   : > { %504 = vbcast.lane.b32.xlu0 %v502_v21, 256 }
 0x10f   : > { %560 = vbcast.lane.b32.xlu0 %v558_v22, 256 }
 0x113   : > { %616 = vbcast.lane.b32.xlu0 %v614_v23, 256 }
 0x117   : > { %455 = vbcast.lane.b32.xlu0 %v453_v24, 256 }
 0x11b   : > { %511 = vbcast.lane.b32.xlu0 %v509_v25, 256 }
 0x11f   : > { %623 = vbcast.lane.b32.xlu0 %v621_v26, 256 }
 0x123   : > { %518 = vbcast.lane.b32.xlu0 %v516_v14, 256 }
 0x127   : > { %630 = vbcast.lane.b32.xlu0 %v628_v27, 256 }
 0x12b   : > { %525 = vbcast.lane.b32.xlu0 %v523_v28, 256 }
 0x12f   : > { %637 = vbcast.lane.b32.xlu0 %v635_v17, 256 }
 0x133   : > { %532 = vbcast.lane.b32.xlu0 %v530_v29, 256 }
 0x137   : > { %644 = vbcast.lane.b32.xlu0 %v642_v30, 256 }
 0x13b   : > { %539 = vbcast.lane.b32.xlu0 %v537_v31, 256 }
 0x13f   : > { %651 = vbcast.lane.b32.xlu0 %v649_v32, 256 }
 0x152   : > { %v342_v33 = vpop.permute.xlu1 %341 }
 0x153   : > { %v339_v35 = vpop.permute.xlu0 %338  ;;  %v371_v48 = vrot.slane %v342_v33, %v370_v43 }
 0x154   : > { %v366_v12 = vrot.slane %v339_v35, %v1608_v42 }
 0x156   : > { %v351_v36 = vpop.permute.xlu1 %350  ;;  %v373_v55 = vsel %vm372_vm0, %v371_v48, %v366_v12 }
 0x157   : > { %v391_v52 = vrot.slane %v351_v36, %v1608_v42 }
 0x15a   : > { %v345_v40 = vpop.permute.xlu1 %344  ;;  %v354_v41 = vpop.permute.xlu0 %353 }
 0x15b   : > { %v395_v49 = vrot.slane %v354_v41, %v370_v43  ;;  %v378_v50 = vrot.slane %v345_v40, %v377_v44 }
 0x15d   : > { %v396_v56 = vsel %vm372_vm0, %v395_v49, %v391_v52  ;;  %v380_v13 = vsel %vm379_vm1, %v378_v50, %v373_v55 }
 0x15e   : > { %v348_v46 = vpop.permute.xlu1 %347  ;;  %v357_v47 = vpop.permute.xlu0 %356 }
 0x15f   : > { %v400_v51 = vrot.slane %v357_v47, %v377_v44  ;;  %v385_v53 = vrot.slane %v348_v46, %v384_v45 }
 0x161   : > { %v401_v58 = vsel %vm379_vm1, %v400_v51, %v396_v56  ;;  %v387_v59 = vsel %vm386_vm2, %v385_v53, %v380_v13 }
 0x162   : > { %v360_v54 = vpop.permute.xlu0 %359  ;;  %v449_v7 = vpop.permute.xlu1 %448 }
 0x163   : > { %v405_v57 = vrot.slane %v360_v54, %v384_v45 }
 0x165   : > { %v406_v60 = vsel %vm386_vm2, %v405_v57, %v401_v58 }
 0x166   : > { %v408_v61 = vsel %vm407_vm3, %v406_v60, %v387_v59  ;;  %v421_v63 = vpop.permute.xlu0 %420  ;;  %v568_v11 = vpop.permute.xlu1 %567 }
 0x167   : > { %v411_v62 = vsel %vm410_vm4, %v408_v61, 0.0 }
 0x168   : > { %412 = vadd.xlane.f32.xlu1 %v411_v62 }
 0x16a   : > { %v435_v3 = vpop.permute.xlu0 %434  ;;  %v463_v16 = vpop.permute.xlu1 %462 }
 0x16e   : > { %v442_v10 = vpop.permute.xlu0 %441  ;;  %v575_v19 = vpop.permute.xlu1 %574 }
 0x172   : > { %v491_v15 = vpop.permute.xlu0 %490  ;;  %v1616_v21 = vpop.permute.xlu1 %469 }
 0x176   : > { %v498_v18 = vpop.permute.xlu0 %497  ;;  %v1618_v23 = vpop.permute.xlu1 %581 }
 0x17a   : > { %v547_v20 = vpop.permute.xlu0 %546  ;;  %v1620_v25 = vpop.permute.xlu1 %476 }
 0x17e   : > { %v554_v22 = vpop.permute.xlu0 %553  ;;  %v1622_v14 = vpop.permute.xlu1 %588 }
 0x182   : > { %v603_v24 = vpop.permute.xlu0 %602  ;;  %v1624_v28 = vpop.permute.xlu1 %483 }
 0x186   : > { %v610_v26 = vpop.permute.xlu0 %609  ;;  %v1626_v29 = vpop.permute.xlu1 %595 }
 0x18a   : > { %v505_v27 = vpop.permute.xlu0 %504 }
 0x18e   : > { %v561_v17 = vpop.permute.xlu0 %560 }
 0x192   : > { %v617_v30 = vpop.permute.xlu0 %616 }
 0x196   : > { %v456_v33 = vpop.permute.xlu0 %455 }
 0x19a   : > { %v512_v37 = vpop.permute.xlu0 %511 }
 0x19e   : > { %v624_v43 = vpop.permute.xlu0 %623 }
 0x1a2   : > { %v519_v46 = vpop.permute.xlu0 %518 }
 0x1a6   : > { %v631_v50 = vpop.permute.xlu0 %630 }
 0x1aa   : > { %v526_v53 = vpop.permute.xlu0 %525 }
 0x1ae   : > { %v638_v13 = vpop.permute.xlu0 %637 }
 0x1b2   : > { %v533_v60 = vpop.permute.xlu0 %532 }
 0x1f5   : > { %v413_v31 = vpop.xlane.xlu1 %412 }
 0x1f6   : > { %v423_v32 = vadd.f32 %v421_v63, %v413_v31 }
 0x1f8   : > { %v1628_v34 = vmax.f32 %v423_v32, 0.0 }
 0x1fa   : > { %v685_v35 = vmul.f32 %v435_v3, %v1628_v34  ;;  %v686_v36 = vmul.f32 %v442_v10, %v1628_v34  ;;  %v693_v38 = vmul.f32 %v491_v15, %v1628_v34  ;;  %v694_v39 = vmul.f32 %v498_v18, %v1628_v34 }
 0x1fb   : > { %v701_v40 = vmul.f32 %v547_v20, %v1628_v34  ;;  %v702_v41 = vmul.f32 %v554_v22, %v1628_v34  ;;  %v709_v44 = vmul.f32 %v603_v24, %v1628_v34  ;;  %v710_v45 = vmul.f32 %v610_v26, %v1628_v34  ;;  %v1671_v24 = vld [vmem:[%s1823_s4] ss:$0 sm:$0xff] }
 0x1fc   : > { %750 = vperm.xlu1 %1273, %v685_v35   ;;  %753 = vperm.xlu0 %1272, %v686_v36   ;;  %v687_v47 = vmul.f32 %v449_v7, %v1628_v34  ;;  %v695_v48 = vmul.f32 %v505_v27, %v1628_v34  ;;  %v703_v12 = vmul.f32 %v561_v17, %v1628_v34  ;;  %v645_v7 = vpop.permute.xlu0 %644 }
 0x1fd   : > { %v711_v49 = vmul.f32 %v617_v30, %v1628_v34  ;;  %v688_v51 = vmul.f32 %v456_v33, %v1628_v34  ;;  %v696_v52 = vmul.f32 %v512_v37, %v1628_v34  ;;  %v704_v54 = vmul.f32 %v568_v11, %v1628_v34 }
 0x1fe   : > { %v712_v55 = vmul.f32 %v624_v43, %v1628_v34  ;;  %v689_v56 = vmul.f32 %v463_v16, %v1628_v34  ;;  %v697_v57 = vmul.f32 %v519_v46, %v1628_v34  ;;  %v705_v58 = vmul.f32 %v575_v19, %v1628_v34 }
 0x1ff   : > { %v713_v59 = vmul.f32 %v631_v50, %v1628_v34  ;;  %v690_v61 = vmul.f32 %v1616_v21, %v1628_v34  ;;  %v698_v62 = vmul.f32 %v526_v53, %v1628_v34  ;;  %v706_v63 = vmul.f32 %v1618_v23, %v1628_v34 }
 0x200   : > { %774 = vperm.xlu1 %1273, %v693_v38   ;;  %777 = vperm.xlu0 %1272, %v694_v39   ;;  %v714_v3 = vmul.f32 %v638_v13, %v1628_v34  ;;  %v691_v10 = vmul.f32 %v1620_v25, %v1628_v34  ;;  %v699_v11 = vmul.f32 %v533_v60, %v1628_v34  ;;  %v540_v16 = vpop.permute.xlu0 %539 }
 0x201   : > { %v707_v15 = vmul.f32 %v1622_v14, %v1628_v34  ;;  %v715_v18 = vmul.f32 %v645_v7, %v1628_v34  ;;  %v692_v19 = vmul.f32 %v1624_v28, %v1628_v34  ;;  %v700_v20 = vmul.f32 %v540_v16, %v1628_v34 }
 0x202   : > { %v708_v22 = vmul.f32 %v1626_v29, %v1628_v34 }
 0x204   : > { %798 = vperm.xlu1 %1273, %v701_v40   ;;  %801 = vperm.xlu0 %1272, %v702_v41   ;;  %v652_v21 = vpop.permute.xlu0 %651 }
 0x205   : > { %v716_v23 = vmul.f32 %v652_v21, %v1628_v34 }
 0x208   : > { %822 = vperm.xlu1 %1273, %v709_v44   ;;  %825 = vperm.xlu0 %1272, %v710_v45  }
 0x20c   : > { %756 = vperm.xlu1 %1273, %v687_v47   ;;  %780 = vperm.xlu0 %1272, %v695_v48  }
 0x210   : > { %804 = vperm.xlu1 %1273, %v703_v12   ;;  %828 = vperm.xlu0 %1272, %v711_v49  }
 0x214   : > { %759 = vperm.xlu1 %1273, %v688_v51   ;;  %783 = vperm.xlu0 %1272, %v696_v52  }
 0x218   : > { %807 = vperm.xlu1 %1273, %v704_v54   ;;  %831 = vperm.xlu0 %1272, %v712_v55  }
 0x21c   : > { %762 = vperm.xlu1 %1273, %v689_v56   ;;  %786 = vperm.xlu0 %1272, %v697_v57  }
 0x220   : > { %810 = vperm.xlu1 %1273, %v705_v58   ;;  %834 = vperm.xlu0 %1272, %v713_v59  }
 0x224   : > { %765 = vperm.xlu1 %1273, %v690_v61   ;;  %789 = vperm.xlu0 %1272, %v698_v62  }
 0x228   : > { %813 = vperm.xlu1 %1273, %v706_v63   ;;  %837 = vperm.xlu0 %1272, %v714_v3  }
 0x22c   : > { %768 = vperm.xlu1 %1273, %v691_v10   ;;  %792 = vperm.xlu0 %1272, %v699_v11  }
 0x230   : > { %816 = vperm.xlu1 %1273, %v707_v15   ;;  %840 = vperm.xlu0 %1272, %v715_v18  }
 0x234   : > { %771 = vperm.xlu1 %1273, %v692_v19   ;;  %795 = vperm.xlu0 %1272, %v700_v20  }
 0x238   : > { %819 = vperm.xlu1 %1273, %v708_v22   ;;  %843 = vperm.xlu0 %1272, %v716_v23  }
 0x23c   : > { %1034 = vbcast.lane.b32.xlu1 %v1671_v24, 264  ;;  %1030 = vbcast.lane.b32.xlu0 %v1671_v24, 256 }
 0x27b   : > { %v751_v25 = vpop.permute.xlu1 %750  ;;  %v754_v26 = vpop.permute.xlu0 %753 }
 0x27c   : > { %v848_v48 = vrot.slane %v751_v25, %v1608_v42  ;;  %v852_v12 = vrot.slane %v754_v26, %v1608_v42 }
 0x27e   : > { %v973_v61 = vsel %vm407_vm3, %v852_v12, %v848_v48 }
 0x27f   : > { %v775_v14 = vpop.permute.xlu1 %774  ;;  %v778_v27 = vpop.permute.xlu0 %777 }
 0x280   : > { %v880_v49 = vrot.slane %v775_v14, %v1608_v42  ;;  %v884_v50 = vrot.slane %v778_v27, %v1608_v42 }
 0x282   : > { %v986_v62 = vsel %vm407_vm3, %v884_v50, %v880_v49 }
 0x283   : > { %v799_v28 = vpop.permute.xlu1 %798  ;;  %v802_v17 = vpop.permute.xlu0 %801 }
 0x284   : > { %v912_v51 = vrot.slane %v799_v28, %v1608_v42  ;;  %v916_v52 = vrot.slane %v802_v17, %v1608_v42 }
 0x286   : > { %v993_v3 = vsel %vm407_vm3, %v916_v52, %v912_v51 }
 0x287   : > { %v823_v29 = vpop.permute.xlu1 %822  ;;  %v826_v30 = vpop.permute.xlu0 %825 }
 0x288   : > { %v944_v53 = vrot.slane %v823_v29, %v1608_v42  ;;  %v948_v54 = vrot.slane %v826_v30, %v1608_v42 }
 0x28a   : > { %v1000_v7 = vsel %vm407_vm3, %v948_v54, %v944_v53 }
 0x28b   : > { %v757_v31 = vpop.permute.xlu1 %756  ;;  %v781_v32 = vpop.permute.xlu0 %780 }
 0x28c   : > { %v856_v56 = vrot.slane %v757_v31, %v1608_v42  ;;  %v888_v57 = vrot.slane %v781_v32, %v1608_v42 }
 0x28e   : > { %v975_v16 = vsel %vm974_vm5, %v856_v56, %v973_v61  ;;  %v987_v18 = vsel %vm974_vm5, %v888_v57, %v986_v62 }
 0x28f   : > { %v805_v33 = vpop.permute.xlu1 %804  ;;  %v829_v34 = vpop.permute.xlu0 %828 }
 0x290   : > { %v920_v58 = vrot.slane %v805_v33, %v1608_v42  ;;  %v952_v59 = vrot.slane %v829_v34, %v1608_v42 }
 0x292   : > { %v994_v22 = vsel %vm974_vm5, %v920_v58, %v993_v3  ;;  %v1001_v23 = vsel %vm974_vm5, %v952_v59, %v1000_v7 }
 0x293   : > { %v760_v35 = vpop.permute.xlu1 %759  ;;  %v784_v36 = vpop.permute.xlu0 %783 }
 0x294   : > { %v860_v60 = vrot.slane %v760_v35, %v1608_v42  ;;  %v892_v63 = vrot.slane %v784_v36, %v1608_v42 }
 0x296   : > { %v977_v25 = vsel %vm976_vm6, %v860_v60, %v975_v16  ;;  %v988_v14 = vsel %vm976_vm6, %v892_v63, %v987_v18 }
 0x297   : > { %v1675_v37 = vpop.permute.xlu1 %807  ;;  %v1677_v38 = vpop.permute.xlu0 %831 }
 0x298   : > { %v924_v27 = vrot.slane %v1675_v37, %v1608_v42  ;;  %v956_v28 = vrot.slane %v1677_v38, %v1608_v42 }
 0x29a   : > { %v1002_v12 = vsel %vm976_vm6, %v956_v28, %v1001_v23 }
 0x29b   : > { %v763_v39 = vpop.permute.xlu1 %762  ;;  %v787_v40 = vpop.permute.xlu0 %786 }
 0x29c   : > { %v864_v10 = vrot.slane %v763_v39, %v1608_v42  ;;  %v896_v11 = vrot.slane %v787_v40, %v1608_v42 }
 0x29e   : > { %v979_v29 = vsel %vm978_vm7, %v864_v10, %v977_v25  ;;  %v989_v30 = vsel %vm978_vm7, %v896_v11, %v988_v14 }
 0x29f   : > { %v1679_v41 = vpop.permute.xlu1 %810  ;;  %v1681_v43 = vpop.permute.xlu0 %834 }
 0x2a0   : > { %v928_v31 = vrot.slane %v1679_v41, %v1608_v42  ;;  %v960_v32 = vrot.slane %v1681_v43, %v1608_v42 }
 0x2a2   : > { %v1003_v52 = vsel %vm978_vm7, %v960_v32, %v1002_v12 }
 0x2a3   : > { %v766_v44 = vpop.permute.xlu1 %765  ;;  %v790_v45 = vpop.permute.xlu0 %789 }
 0x2a4   : > { %v868_v19 = vrot.slane %v766_v44, %v1608_v42  ;;  %v900_v20 = vrot.slane %v790_v45, %v1608_v42  ;;  %v995_v44 = vsel %vm976_vm6, %v924_v27, %v994_v22 }
 0x2a5   : > { %v996_v49 = vsel %vm978_vm7, %v928_v31, %v995_v44 }
 0x2a6   : > { %v981_v34 = vsel %vm980_vm8, %v868_v19, %v979_v29  ;;  %v990_v35 = vsel %vm980_vm8, %v900_v20, %v989_v30 }
 0x2a7   : > { %v1683_v46 = vpop.permute.xlu1 %813  ;;  %v1685_v47 = vpop.permute.xlu0 %837 }
 0x2a8   : > { %v932_v36 = vrot.slane %v1683_v46, %v1608_v42  ;;  %v964_v39 = vrot.slane %v1685_v47, %v1608_v42 }
 0x2aa   : > { %v997_v53 = vsel %vm980_vm8, %v932_v36, %v996_v49  ;;  %v1004_v57 = vsel %vm980_vm8, %v964_v39, %v1003_v52 }
 0x2ab   : > { %v769_v55 = vpop.permute.xlu1 %768  ;;  %v793_v13 = vpop.permute.xlu0 %792 }
 0x2ac   : > { %v872_v26 = vrot.slane %v769_v55, %v1608_v42  ;;  %v904_v17 = vrot.slane %v793_v13, %v1608_v42 }
 0x2ae   : > { %v983_v43 = vsel %vm982_vm9, %v872_v26, %v981_v34  ;;  %v991_v46 = vsel %vm982_vm9, %v904_v17, %v990_v35 }
 0x2af   : > { %v817_v15 = vpop.permute.xlu1 %816  ;;  %v841_v21 = vpop.permute.xlu0 %840 }
 0x2b0   : > { %v936_v40 = vrot.slane %v817_v15, %v1608_v42  ;;  %v968_v45 = vrot.slane %v841_v21, %v1608_v42 }
 0x2b2   : > { %v998_v58 = vsel %vm982_vm9, %v936_v40, %v997_v53  ;;  %v1005_v60 = vsel %vm982_vm9, %v968_v45, %v1004_v57 }
 0x2b3   : > { %v772_v33 = vpop.permute.xlu1 %771  ;;  %v796_v38 = vpop.permute.xlu0 %795 }
 0x2b4   : > { %v876_v37 = vrot.slane %v772_v33, %v1608_v42  ;;  %v908_v41 = vrot.slane %v796_v38, %v1608_v42 }
 0x2b6   : > { %v985_v48 = vsel %vm984_vm10, %v876_v37, %v983_v43  ;;  %v992_v51 = vsel %vm984_vm10, %v908_v41, %v991_v46 }
 0x2b7   : > { %v820_v50 = vpop.permute.xlu1 %819  ;;  %v1012_v47 = vsel %vm1011_vm11, %v985_v48, 0.0  ;;  %v844_v55 = vpop.permute.xlu0 %843  ;;  %v1015_v56 = vsel %vm1011_vm11, %v992_v51, 0.0 }
 0x2b8   : > { %v940_v54 = vrot.slane %v820_v50, %v1608_v42  ;;  %1013 = vadd.xlane.f32.xlu1 %v1012_v47  ;;  %v972_v13 = vrot.slane %v844_v55, %v1608_v42  ;;  %1016 = vadd.xlane.f32.xlu0 %v1015_v56 }
 0x2ba   : > { %v999_v59 = vsel %vm984_vm10, %v940_v54, %v998_v58  ;;  %v1006_v62 = vsel %vm984_vm10, %v972_v13, %v1005_v60 }
 0x2bb   : > { %v1018_v61 = vsel %vm1011_vm11, %v999_v59, 0.0  ;;  %v1021_v63 = vsel %vm1011_vm11, %v1006_v62, 0.0  ;;  %v1035_v42 = vpop.permute.xlu1 %1034  ;;  %v1031_v3 = vpop.permute.xlu0 %1030 }
 0x2bc   : > { %1019 = vadd.xlane.f32.xlu0 %v1018_v61  ;;  %1022 = vadd.xlane.f32.xlu1 %v1021_v63 }
 0x2cd   : > { %1038 = vbcast.lane.b32.xlu1 %v1671_v24, 272 }
 0x2d2   : > { %1042 = vbcast.lane.b32.xlu0 %v1671_v24, 280 }
 0x345   : > { %v1014_v7 = vpop.xlane.xlu1 %1013  ;;  %v1017_v11 = vpop.xlane.xlu0 %1016 }
 0x346   : > { %v1048_v10 = vadd.f32 %v1031_v3, %v1014_v7  ;;  %v1049_v15 = vadd.f32 %v1035_v42, %v1017_v11 }
 0x348   : > { %v1210_v16 = vmul.f32 -1.442695, %v1048_v10  ;;  %v1211_v18 = vmul.f32 -1.442695, %v1049_v15 }
 0x349   : > { %v1023_v19 = vpop.xlane.xlu1 %1022  ;;  %v1020_v20 = vpop.xlane.xlu0 %1019 }
 0x34a   : > { %1274 = vpow2.f32 %v1210_v16 }
 0x34b   : > { %1276 = vpow2.f32 %v1211_v18 }
 0x34d   : > { %v1039_v21 = vpop.permute.xlu1 %1038  ;;  %v1043_v22 = vpop.permute.xlu0 %1042 }
 0x34e   : > { %v1050_v23 = vadd.f32 %v1039_v21, %v1020_v20  ;;  %v1051_v25 = vadd.f32 %v1043_v22, %v1023_v19 }
 0x350   : > { %v1212_v26 = vmul.f32 -1.442695, %v1050_v23  ;;  %v1213_v14 = vmul.f32 -1.442695, %v1051_v25 }
 0x352   : > { %1278 = vpow2.f32 %v1212_v26 }
 0x353   : > { %1280 = vpow2.f32 %v1213_v14 }
 0x354   : > { %v1275_v24 = vpop.eup %1274 }
 0x355   : > { %v1277_v27 = vpop.eup %1276  ;;  %v1064_v28 = vadd.f32 1.0, %v1275_v24 }
 0x356   : > { %v1065_v17 = vadd.f32 1.0, %v1277_v27 }
 0x357   : > { %1282 = vrcp.f32 %v1064_v28 }
 0x358   : > { %1284 = vrcp.f32 %v1065_v17 }
 0x35c   : > { %v1279_v29 = vpop.eup %1278 }
 0x35d   : > { %v1281_v30 = vpop.eup %1280  ;;  %v1066_v31 = vadd.f32 1.0, %v1279_v29 }
 0x35e   : > { %v1067_v32 = vadd.f32 1.0, %v1281_v30 }
 0x35f   : > { %1286 = vrcp.f32 %v1066_v31 }
 0x360   : > { %1288 = vrcp.f32 %v1067_v32 }
 0x361   : > { %v1283_v33 = vpop.eup %1282 }
 0x362   : > { %v1285_v34 = vpop.eup %1284  ;;  %1078 = vperm.xlu1 %1273, %v1283_v33  }
 0x363   : > { %1083 = vperm.xlu0 %1272, %v1285_v34  }
 0x369   : > { %v1287_v35 = vpop.eup %1286 }
 0x36a   : > { %v1289_v36 = vpop.eup %1288  ;;  %1088 = vperm.xlu1 %1273, %v1287_v35  }
 0x36b   : > { %1093 = vperm.xlu0 %1272, %v1289_v36  }
 0x3e1   : > { %v1079_v37 = vpop.permute.xlu1 %1078 }
 0x3e2   : > { %v1096_v38 = vmul.f32 %v1079_v37, %v1543_v2  ;;  %v1097_v39 = vmul.f32 %v1079_v37, %v1547_v4  ;;  %v1084_v40 = vpop.permute.xlu0 %1083 }
 0x3e3   : > { %v1098_v41 = vmul.f32 %v1084_v40, %v1555_v8  ;;  %v1099_v43 = vmul.f32 %v1084_v40, %v1557_v9 }
 0x3e4   : > { %1104 = vst [vmem:[%s242_s29] sm:$0xff] %v1096_v38  ;;  %1105 = vst [vmem:[%s242_s29 + $0x8] sm:$0xff] %v1097_v39 }
 0x3e5   : > { %1106 = vst [vmem:[%s242_s29 + $0x10] sm:$0xff] %v1098_v41  ;;  %1107 = vst [vmem:[%s242_s29 + $0x18] sm:$0xff] %v1099_v43 }
 0x3e9   : > { %v1089_v2 = vpop.permute.xlu1 %1088 }
 0x3ea   : > { %v1100_v4 = vmul.f32 %v1089_v2, %v1539_v0  ;;  %v1101_v8 = vmul.f32 %v1089_v2, %v1541_v1  ;;  %v1094_v9 = vpop.permute.xlu0 %1093 }
 0x3eb   : > { %v1102_v44 = vmul.f32 %v1094_v9, %v1549_v5  ;;  %v1103_v45 = vmul.f32 %v1094_v9, %v1551_v6 }
 0x3ec   : > { %1108 = vst [vmem:[%s242_s29 + $0x20] sm:$0xff] %v1100_v4  ;;  %1109 = vst [vmem:[%s242_s29 + $0x28] sm:$0xff] %v1101_v8 }
 0x3ed   : > { %1110 = vst [vmem:[%s242_s29 + $0x30] sm:$0xff] %v1102_v44  ;;  %1111 = vst [vmem:[%s242_s29 + $0x38] sm:$0xff] %v1103_v45 }
 0x3ee   : > { %1333 = shalt.err (!%p1330_p2)
}
 0x3ef   : > { %s1334_s11 = scalar_lea.hbm %s1773_s16, 1024  ;;  %s1338_s26 = scalar_lea.hbm %s1824_s5, 2048 }
 0x3f0   : > { %p1335_p4 = scmp.ne.s32.totalorder %s1773_s16, %s1334_s11  ;;  %p1339_p9 = scmp.lt.u32.totalorder %s1773_s16, %s1824_s5 }
 0x3f1   : > { %p1340_p1 = scmp.lt.u32.totalorder %s1338_s26, %s1334_s11  ;;  %p1342_p6 = scmp.lt.u32.totalorder %s1334_s11, %s1773_s16 }
 0x3f2   : > { %p1336_p5 = pnand %p1335_p4, %p1831_p11 }
 0x3f3   : > { %p1341_p3 = por %p1340_p1, %p1339_p9 }
 0x3f4   : > { %p1337_p7 = pneg %p1336_p5 }
 0x3f5   : > { %p1343_p12 = por %p1342_p6, %p1341_p3 }
 0x3f7   : > { %p1344_p13 = pnand %p1343_p12, %p1337_p7 }
 0x3f9   : > { %1347 = shalt.err (!%p1344_p13)
}
 0x3fa   : > { %s1393_s14 = smov 256   ;;  %s1394_s15 = smov 16  }
 0x3fb   : > { %1223 = dma.vmem_to_hbm [thread:$0]  (%p1831_p11), %s1766_s12, 1024, %s1773_s16, %s1113_s22, %s1393_s14, %s1393_s14, %s1394_s15  }
 0x3fc PF: > { %s1141_s25 = sand.u32 1, %s1374_s18   ;;  %p1832_p8 = scmp.ne.s32.totalorder %s1829_s6, 0 }
 0x3fd   : > { %p1833_p10 = scmp.ge.s32.totalorder %s1386_s21, 2  ;;  %s1142_s8 = scalar_lea.sflag [#allocation4], %s1141_s25 }
 0x3ff   : > { %p1230_p0 = pnand %p1833_p10, %p1832_p8 }
 0x401   : > { %1369 = dma.done.wait (!%p1230_p0), %s1142_s8, 1024  }
 0x402   : > { %1371 = vsyncadd (!%p1230_p0), %s1142_s8, 4294966272  ;;  %p18_p2 = scmp.ge.s32.totalorder %s1450_s24, 4   ;;  %s1834_s18 = smov %s1378_s19 }
 0x403   : > { %s1835_s19 = smov %s1382_s20  ;;  %s1836_s20 = smov %s1462_s27 }
 0x404   : > { %s1837_s21 = smov %s1450_s24  ;;  %20 = sbr.rel (!%p18_p2) target bundleno = 5 (0x5), region = 85 }
 0x40b   :  { %1147 = vsyncpa [#allocation3], 1 }
 0x40c   :  { %1149 = vsyncpa [#allocation3 + $0x1], 1 }
 0x40d   :  { %1150 = vsyncpa [#allocation4], 1 }
 0x40e   :  { %1152 = vsyncpa [#allocation4 + $0x1], 1 }

</bundles_post_ra>
